<compile_context>
chip_gen: v5e
topology: v5e:2x2
jax: 0.10.0
libtpu: 0.0.40
codegen_flags: <defaults>
</compile_context>

<pallas_src>
import functools
import math

import jax
import jax.numpy as jnp
from jax.experimental import pallas as pl
from jax.experimental.pallas import tpu as pltpu


def _round_up(x, m):
    return ((x + m - 1) // m) * m


def rnn_kernel(x_ref, len_ref, wih_ref, whh_ref, b_ref, wfc_ref, bfc_ref,
               out_ref, xw_scr, *, t_steps, bp):
    """Whole-sequence RNN forward in a single kernel invocation.

    x_ref   : (T*Bp, Ep)  time-major embeddings, flattened over (t, b)
    len_ref : (Bp, 1)     int32 sequence lengths (0 for padded batch rows)
    wih_ref : (Ep, Hp)    input->hidden weight (pre-transposed, zero-padded)
    whh_ref : (Hp, Hp)    hidden->hidden weight (pre-transposed, zero-padded)
    b_ref   : (1, Hp)     b_ih + b_hh (zero-padded)
    wfc_ref : (Hp, Cp)    fc weight (pre-transposed, zero-padded)
    bfc_ref : (1, Cp)     fc bias (zero-padded)
    out_ref : (Bp, Cp)    scores (lane-dense; caller slices [:B, :C])
    xw_scr  : (T*Bp, Hp)  VMEM scratch holding the hoisted input projection
    """
    hp = whh_ref.shape[0]

    # Hoist the input projection out of the recurrence: one big MXU matmul.
    xw_scr[...] = (
        jnp.dot(x_ref[...], wih_ref[...], preferred_element_type=jnp.float32)
        + b_ref[...])

    len_vec = len_ref[...]                # (Bp, 1) int32
    whh = whh_ref[...]                    # (Hp, Hp), resident across the loop

    def step(t, h_prev):
        off = pl.multiple_of(t * bp, bp)
        pre = xw_scr[pl.ds(off, bp), :] + jnp.dot(
            h_prev, whh, preferred_element_type=jnp.float32)
        h_new = jnp.tanh(pre)
        # pack_padded_sequence semantics: past a sequence's length the hidden
        # state is frozen, so the final h == hidden at the last valid step.
        valid = t < len_vec               # (Bp, 1) bool, broadcasts over Hp
        return jnp.where(valid, h_new, h_prev)

    h0 = jnp.zeros((bp, hp), jnp.float32)
    h_final = jax.lax.fori_loop(0, t_steps, step, h0, unroll=True)

    # fc(dropout(h_out))  -- dropout treated as identity (see TODO above).
    out_ref[...] = (
        jnp.dot(h_final, wfc_ref[...], preferred_element_type=jnp.float32)
        + bfc_ref[...]).astype(out_ref.dtype)


def rnn_forward(tokens, lengths, params):
    """tokens: (B, T) int32, lengths: (B,) int32 -> scores (B, C) float32."""
    emb_table, w_ih, w_hh, bias, w_fc, b_fc = (
        params["emb"], params["w_ih"], params["w_hh"],
        params["bias"], params["w_fc"], params["b_fc"],
    )
    B, T = tokens.shape
    E = emb_table.shape[1]
    H = w_hh.shape[0]
    C = w_fc.shape[1]

    # Lane/sublane-dense padded sizes.
    Bp = _round_up(B, 8)
    Ep = _round_up(E, 128)
    Hp = _round_up(H, 128)
    Cp = _round_up(C, 128)

    # Embedding gather, directly time-major (avoids an extra HBM transpose pass).
    x_tm = emb_table[tokens.T]                              # (T, B, E)
    x_tm = jnp.pad(x_tm, ((0, 0), (0, Bp - B), (0, Ep - E)))
    x2d = x_tm.reshape(T * Bp, Ep)                          # (T*Bp, Ep)

    len2d = jnp.pad(lengths.astype(jnp.int32), (0, Bp - B)).reshape(Bp, 1)

    # Zero-pad weights to lane-dense shapes (exact: padded rows/cols are 0, so
    # padded hidden/output columns stay identically 0 and are sliced away).
    w_ih_p = jnp.pad(w_ih, ((0, Ep - E), (0, Hp - H)))
    w_hh_p = jnp.pad(w_hh, ((0, Hp - H), (0, Hp - H)))
    bias_p = jnp.pad(bias, ((0, 0), (0, Hp - H)))
    w_fc_p = jnp.pad(w_fc, ((0, Hp - H), (0, Cp - C)))
    b_fc_p = jnp.pad(b_fc, ((0, 0), (0, Cp - C)))

    kernel = functools.partial(rnn_kernel, t_steps=T, bp=Bp)
    vmem_spec = pl.BlockSpec(memory_space=pltpu.MemorySpace.VMEM)

    out = pl.pallas_call(
        kernel,
        out_shape=jax.ShapeDtypeStruct((Bp, Cp), jnp.float32),
        in_specs=[vmem_spec] * 7,
        out_specs=vmem_spec,
        scratch_shapes=[pltpu.VMEM((T * Bp, Hp), jnp.float32)],
    )(x2d, len2d, w_ih_p, w_hh_p, bias_p, w_fc_p, b_fc_p)

    # scores.squeeze(): drop padding -> (B, C).
    return out[:B, :C]


def rnn_reference(tokens, lengths, params):
    """Pure-JAX reference of the same forward pass (for validation)."""
    emb_table, w_ih, w_hh, bias, w_fc, b_fc = (
        params["emb"], params["w_ih"], params["w_hh"],
        params["bias"], params["w_fc"], params["b_fc"],
    )
    B, T = tokens.shape
    H = w_hh.shape[0]
    x = emb_table[tokens]                                   # (B, T, E)

    def step(h, inp):
        x_t, t = inp
        h_new = jnp.tanh(x_t @ w_ih + h @ w_hh + bias)
        valid = (t < lengths)[:, None]
        return jnp.where(valid, h_new, h), None

    h0 = jnp.zeros((B, H), jnp.float32)
    xs = (jnp.transpose(x, (1, 0, 2)), jnp.arange(T))
    h_final, _ = jax.lax.scan(step, h0, xs)
    return h_final @ w_fc + b_fc


def init_params(key, vocab_size, padding_idx, embedding_dim, hidden_dim,
                category_size):
    k_emb, k_wih, k_whh, k_bih, k_bhh, k_wfc, k_bfc = jax.random.split(key, 7)

    emb = jax.random.normal(k_emb, (vocab_size, embedding_dim),
                            dtype=jnp.float32)
    emb = emb.at[padding_idx].set(0.0)              # padding_idx row zeroed

    bound_rnn = 1.0 / math.sqrt(hidden_dim)
    w_ih = jax.random.uniform(k_wih, (hidden_dim, embedding_dim),
                              minval=-bound_rnn, maxval=bound_rnn,
                              dtype=jnp.float32)
    w_hh = jax.random.uniform(k_whh, (hidden_dim, hidden_dim),
                              minval=-bound_rnn, maxval=bound_rnn,
                              dtype=jnp.float32)
    b_ih = jax.random.uniform(k_bih, (hidden_dim,),
                              minval=-bound_rnn, maxval=bound_rnn,
                              dtype=jnp.float32)
    b_hh = jax.random.uniform(k_bhh, (hidden_dim,),
                              minval=-bound_rnn, maxval=bound_rnn,
                              dtype=jnp.float32)

    bound_fc = 1.0 / math.sqrt(hidden_dim)
    w_fc = jax.random.uniform(k_wfc, (category_size, hidden_dim),
                              minval=-bound_fc, maxval=bound_fc,
                              dtype=jnp.float32)
    b_fc = jax.random.uniform(k_bfc, (category_size,),
                              minval=-bound_fc, maxval=bound_fc,
                              dtype=jnp.float32)

    return {
        "emb": emb,
        "w_ih": w_ih.T,                             # (E, H)
        "w_hh": w_hh.T,                             # (H, H)
        "bias": (b_ih + b_hh).reshape(1, hidden_dim),
        "w_fc": w_fc.T,                             # (H, C)
        "b_fc": b_fc.reshape(1, category_size),
    }


if __name__ == "__main__":
    # Small, module-consistent shapes.
    VOCAB, PAD_IDX = 50, 0
    E, H, C = 64, 32, 4
    B, T = 4, 10

    key = jax.random.PRNGKey(0)
    k_params, k_tok, k_len = jax.random.split(key, 3)

    params = init_params(k_params, VOCAB, PAD_IDX, E, H, C)

    lengths = jax.random.randint(k_len, (B,), 1, T + 1, dtype=jnp.int32)
    tokens = jax.random.randint(k_tok, (B, T), 1, VOCAB, dtype=jnp.int32)
    # pad positions beyond each sequence's length with padding_idx
    pos = jnp.arange(T)[None, :]
    tokens = jnp.where(pos < lengths[:, None], tokens, PAD_IDX)

    scores = jax.jit(rnn_forward)(tokens, lengths, params)
    scores = jax.block_until_ready(scores)

    assert scores.shape == (B, C)
    assert bool(jnp.all(jnp.isfinite(scores)))

    # Validate against a pure-JAX reference of the same math (loose tolerance
    # to allow MXU vs. XLA f32-matmul accumulation differences).
    ref = rnn_reference(tokens, lengths, params)
    assert jnp.allclose(scores, ref, atol=1e-2, rtol=1e-2), (
        float(jnp.max(jnp.abs(scores - ref))))

    print("KERNEL_OK")
</pallas_src>

<mosaic_0001>
module attributes {stable_mosaic.version = 11 : i64} {
  func.func @rnn_kernel(%arg0: memref<80x128xf32, #tpu.memory_space<vmem>>, %arg1: memref<8x1xi32, #tpu.memory_space<vmem>>, %arg2: memref<128x128xf32, #tpu.memory_space<vmem>>, %arg3: memref<128x128xf32, #tpu.memory_space<vmem>>, %arg4: memref<1x128xf32, #tpu.memory_space<vmem>>, %arg5: memref<128x128xf32, #tpu.memory_space<vmem>>, %arg6: memref<1x128xf32, #tpu.memory_space<vmem>>, %arg7: memref<8x128xf32, #tpu.memory_space<vmem>>, %arg8: memref<80x128xf32, #tpu.memory_space<vmem>>) attributes {dimension_semantics = [], scalar_prefetch = 0 : i64, scratch_operands = 1 : i64, tpu.core_type = #tpu.core_type<tc>} {
    %c0 = arith.constant 0 : index
    %c0_0 = arith.constant 0 : index
    %0 = vector.load %arg0[%c0, %c0_0] : memref<80x128xf32, #tpu.memory_space<vmem>>, vector<80x128xf32>
    %c0_1 = arith.constant 0 : index
    %c0_2 = arith.constant 0 : index
    %1 = vector.load %arg2[%c0_1, %c0_2] : memref<128x128xf32, #tpu.memory_space<vmem>>, vector<128x128xf32>
    %cst = arith.constant dense<0.000000e+00> : vector<80x128xf32>
    %2 = tpu.matmul %0, %1, %cst {dimension_numbers = #tpu.dot_dimension_numbers<[1], [0], [0], [1], [0, 0, 1, 1], [], []>} : vector<80x128xf32>, vector<128x128xf32>, vector<80x128xf32> -> vector<80x128xf32>
    %c0_3 = arith.constant 0 : index
    %c0_4 = arith.constant 0 : index
    %3 = vector.load %arg4[%c0_3, %c0_4] : memref<1x128xf32, #tpu.memory_space<vmem>>, vector<1x128xf32>
    %4 = vector.broadcast %3 : vector<1x128xf32> to vector<80x128xf32>
    %5 = arith.addf %2, %4 : vector<80x128xf32>
    %c0_5 = arith.constant 0 : index
    %c0_6 = arith.constant 0 : index
    %6 = vector.load %arg8[%c0_5, %c0_6] : memref<80x128xf32, #tpu.memory_space<vmem>>, vector<80x128xf32>
    tpu.vector_store %arg8[%c0_5, %c0_6], %5 {strides = array<i32>} : memref<80x128xf32, #tpu.memory_space<vmem>>, vector<80x128xf32>,
    %c0_7 = arith.constant 0 : index
    %c0_8 = arith.constant 0 : index
    %7 = vector.load %arg1[%c0_7, %c0_8] : memref<8x1xi32, #tpu.memory_space<vmem>>, vector<8x1xi32>
    %c0_9 = arith.constant 0 : index
    %c0_10 = arith.constant 0 : index
    %8 = vector.load %arg3[%c0_9, %c0_10] : memref<128x128xf32, #tpu.memory_space<vmem>>, vector<128x128xf32>
    %cst_11 = arith.constant 0.000000e+00 : f32
    %9 = vector.broadcast %cst_11 : f32 to vector<8x128xf32>
    %c0_i32 = arith.constant 0 : i32
    %c8_i32 = arith.constant 8 : i32
    %10 = arith.muli %c0_i32, %c8_i32 : i32
    %11 = tpu.assume_multiple %10, 8 : i32
    %12 = arith.index_cast %11 : i32 to index
    %c0_12 = arith.constant 0 : index
    %13 = vector.load %arg8[%12, %c0_12] : memref<80x128xf32, #tpu.memory_space<vmem>>, vector<8x128xf32>
    %cst_13 = arith.constant dense<0.000000e+00> : vector<8x128xf32>
    %14 = tpu.matmul %9, %8, %cst_13 {dimension_numbers = #tpu.dot_dimension_numbers<[1], [0], [0], [1], [0, 0, 1, 1], [], []>} : vector<8x128xf32>, vector<128x128xf32>, vector<8x128xf32> -> vector<8x128xf32>
    %15 = arith.addf %13, %14 : vector<8x128xf32>
    %16 = math.tanh %15 : vector<8x128xf32>
    %17 = vector.broadcast %c0_i32 : i32 to vector<8x1xi32>
    %18 = arith.cmpi slt, %17, %7 : vector<8x1xi32>
    %19 = vector.shape_cast %18 : vector<8x1xi1> to vector<8x1xi1>
    %20 = vector.broadcast %19 : vector<8x1xi1> to vector<8x128xi1>
    %21 = arith.select %20, %16, %9 : vector<8x128xi1>, vector<8x128xf32>
    %c1_i32 = arith.constant 1 : i32
    %c8_i32_14 = arith.constant 8 : i32
    %22 = arith.muli %c1_i32, %c8_i32_14 : i32
    %23 = tpu.assume_multiple %22, 8 : i32
    %24 = arith.index_cast %23 : i32 to index
    %c0_15 = arith.constant 0 : index
    %25 = vector.load %arg8[%24, %c0_15] : memref<80x128xf32, #tpu.memory_space<vmem>>, vector<8x128xf32>
    %cst_16 = arith.constant dense<0.000000e+00> : vector<8x128xf32>
    %26 = tpu.matmul %21, %8, %cst_16 {dimension_numbers = #tpu.dot_dimension_numbers<[1], [0], [0], [1], [0, 0, 1, 1], [], []>} : vector<8x128xf32>, vector<128x128xf32>, vector<8x128xf32> -> vector<8x128xf32>
    %27 = arith.addf %25, %26 : vector<8x128xf32>
    %28 = math.tanh %27 : vector<8x128xf32>
    %29 = vector.broadcast %c1_i32 : i32 to vector<8x1xi32>
    %30 = arith.cmpi slt, %29, %7 : vector<8x1xi32>
    %31 = vector.shape_cast %30 : vector<8x1xi1> to vector<8x1xi1>
    %32 = vector.broadcast %31 : vector<8x1xi1> to vector<8x128xi1>
    %33 = arith.select %32, %28, %21 : vector<8x128xi1>, vector<8x128xf32>
    %c2_i32 = arith.constant 2 : i32
    %c8_i32_17 = arith.constant 8 : i32
    %34 = arith.muli %c2_i32, %c8_i32_17 : i32
    %35 = tpu.assume_multiple %34, 8 : i32
    %36 = arith.index_cast %35 : i32 to index
    %c0_18 = arith.constant 0 : index
    %37 = vector.load %arg8[%36, %c0_18] : memref<80x128xf32, #tpu.memory_space<vmem>>, vector<8x128xf32>
    %cst_19 = arith.constant dense<0.000000e+00> : vector<8x128xf32>
    %38 = tpu.matmul %33, %8, %cst_19 {dimension_numbers = #tpu.dot_dimension_numbers<[1], [0], [0], [1], [0, 0, 1, 1], [], []>} : vector<8x128xf32>, vector<128x128xf32>, vector<8x128xf32> -> vector<8x128xf32>
    %39 = arith.addf %37, %38 : vector<8x128xf32>
    %40 = math.tanh %39 : vector<8x128xf32>
    %41 = vector.broadcast %c2_i32 : i32 to vector<8x1xi32>
    %42 = arith.cmpi slt, %41, %7 : vector<8x1xi32>
    %43 = vector.shape_cast %42 : vector<8x1xi1> to vector<8x1xi1>
    %44 = vector.broadcast %43 : vector<8x1xi1> to vector<8x128xi1>
    %45 = arith.select %44, %40, %33 : vector<8x128xi1>, vector<8x128xf32>
    %c3_i32 = arith.constant 3 : i32
    %c8_i32_20 = arith.constant 8 : i32
    %46 = arith.muli %c3_i32, %c8_i32_20 : i32
    %47 = tpu.assume_multiple %46, 8 : i32
    %48 = arith.index_cast %47 : i32 to index
    %c0_21 = arith.constant 0 : index
    %49 = vector.load %arg8[%48, %c0_21] : memref<80x128xf32, #tpu.memory_space<vmem>>, vector<8x128xf32>
    %cst_22 = arith.constant dense<0.000000e+00> : vector<8x128xf32>
    %50 = tpu.matmul %45, %8, %cst_22 {dimension_numbers = #tpu.dot_dimension_numbers<[1], [0], [0], [1], [0, 0, 1, 1], [], []>} : vector<8x128xf32>, vector<128x128xf32>, vector<8x128xf32> -> vector<8x128xf32>
    %51 = arith.addf %49, %50 : vector<8x128xf32>
    %52 = math.tanh %51 : vector<8x128xf32>
    %53 = vector.broadcast %c3_i32 : i32 to vector<8x1xi32>
    %54 = arith.cmpi slt, %53, %7 : vector<8x1xi32>
    %55 = vector.shape_cast %54 : vector<8x1xi1> to vector<8x1xi1>
    %56 = vector.broadcast %55 : vector<8x1xi1> to vector<8x128xi1>
    %57 = arith.select %56, %52, %45 : vector<8x128xi1>, vector<8x128xf32>
    %c4_i32 = arith.constant 4 : i32
    %c8_i32_23 = arith.constant 8 : i32
    %58 = arith.muli %c4_i32, %c8_i32_23 : i32
    %59 = tpu.assume_multiple %58, 8 : i32
    %60 = arith.index_cast %59 : i32 to index
    %c0_24 = arith.constant 0 : index
    %61 = vector.load %arg8[%60, %c0_24] : memref<80x128xf32, #tpu.memory_space<vmem>>, vector<8x128xf32>
    %cst_25 = arith.constant dense<0.000000e+00> : vector<8x128xf32>
    %62 = tpu.matmul %57, %8, %cst_25 {dimension_numbers = #tpu.dot_dimension_numbers<[1], [0], [0], [1], [0, 0, 1, 1], [], []>} : vector<8x128xf32>, vector<128x128xf32>, vector<8x128xf32> -> vector<8x128xf32>
    %63 = arith.addf %61, %62 : vector<8x128xf32>
    %64 = math.tanh %63 : vector<8x128xf32>
    %65 = vector.broadcast %c4_i32 : i32 to vector<8x1xi32>
    %66 = arith.cmpi slt, %65, %7 : vector<8x1xi32>
    %67 = vector.shape_cast %66 : vector<8x1xi1> to vector<8x1xi1>
    %68 = vector.broadcast %67 : vector<8x1xi1> to vector<8x128xi1>
    %69 = arith.select %68, %64, %57 : vector<8x128xi1>, vector<8x128xf32>
    %c5_i32 = arith.constant 5 : i32
    %c8_i32_26 = arith.constant 8 : i32
    %70 = arith.muli %c5_i32, %c8_i32_26 : i32
    %71 = tpu.assume_multiple %70, 8 : i32
    %72 = arith.index_cast %71 : i32 to index
    %c0_27 = arith.constant 0 : index
    %73 = vector.load %arg8[%72, %c0_27] : memref<80x128xf32, #tpu.memory_space<vmem>>, vector<8x128xf32>
    %cst_28 = arith.constant dense<0.000000e+00> : vector<8x128xf32>
    %74 = tpu.matmul %69, %8, %cst_28 {dimension_numbers = #tpu.dot_dimension_numbers<[1], [0], [0], [1], [0, 0, 1, 1], [], []>} : vector<8x128xf32>, vector<128x128xf32>, vector<8x128xf32> -> vector<8x128xf32>
    %75 = arith.addf %73, %74 : vector<8x128xf32>
    %76 = math.tanh %75 : vector<8x128xf32>
    %77 = vector.broadcast %c5_i32 : i32 to vector<8x1xi32>
    %78 = arith.cmpi slt, %77, %7 : vector<8x1xi32>
    %79 = vector.shape_cast %78 : vector<8x1xi1> to vector<8x1xi1>
    %80 = vector.broadcast %79 : vector<8x1xi1> to vector<8x128xi1>
    %81 = arith.select %80, %76, %69 : vector<8x128xi1>, vector<8x128xf32>
    %c6_i32 = arith.constant 6 : i32
    %c8_i32_29 = arith.constant 8 : i32
    %82 = arith.muli %c6_i32, %c8_i32_29 : i32
    %83 = tpu.assume_multiple %82, 8 : i32
    %84 = arith.index_cast %83 : i32 to index
    %c0_30 = arith.constant 0 : index
    %85 = vector.load %arg8[%84, %c0_30] : memref<80x128xf32, #tpu.memory_space<vmem>>, vector<8x128xf32>
    %cst_31 = arith.constant dense<0.000000e+00> : vector<8x128xf32>
    %86 = tpu.matmul %81, %8, %cst_31 {dimension_numbers = #tpu.dot_dimension_numbers<[1], [0], [0], [1], [0, 0, 1, 1], [], []>} : vector<8x128xf32>, vector<128x128xf32>, vector<8x128xf32> -> vector<8x128xf32>
    %87 = arith.addf %85, %86 : vector<8x128xf32>
    %88 = math.tanh %87 : vector<8x128xf32>
    %89 = vector.broadcast %c6_i32 : i32 to vector<8x1xi32>
    %90 = arith.cmpi slt, %89, %7 : vector<8x1xi32>
    %91 = vector.shape_cast %90 : vector<8x1xi1> to vector<8x1xi1>
    %92 = vector.broadcast %91 : vector<8x1xi1> to vector<8x128xi1>
    %93 = arith.select %92, %88, %81 : vector<8x128xi1>, vector<8x128xf32>
    %c7_i32 = arith.constant 7 : i32
    %c8_i32_32 = arith.constant 8 : i32
    %94 = arith.muli %c7_i32, %c8_i32_32 : i32
    %95 = tpu.assume_multiple %94, 8 : i32
    %96 = arith.index_cast %95 : i32 to index
    %c0_33 = arith.constant 0 : index
    %97 = vector.load %arg8[%96, %c0_33] : memref<80x128xf32, #tpu.memory_space<vmem>>, vector<8x128xf32>
    %cst_34 = arith.constant dense<0.000000e+00> : vector<8x128xf32>
    %98 = tpu.matmul %93, %8, %cst_34 {dimension_numbers = #tpu.dot_dimension_numbers<[1], [0], [0], [1], [0, 0, 1, 1], [], []>} : vector<8x128xf32>, vector<128x128xf32>, vector<8x128xf32> -> vector<8x128xf32>
    %99 = arith.addf %97, %98 : vector<8x128xf32>
    %100 = math.tanh %99 : vector<8x128xf32>
    %101 = vector.broadcast %c7_i32 : i32 to vector<8x1xi32>
    %102 = arith.cmpi slt, %101, %7 : vector<8x1xi32>
    %103 = vector.shape_cast %102 : vector<8x1xi1> to vector<8x1xi1>
    %104 = vector.broadcast %103 : vector<8x1xi1> to vector<8x128xi1>
    %105 = arith.select %104, %100, %93 : vector<8x128xi1>, vector<8x128xf32>
    %c8_i32_35 = arith.constant 8 : i32
    %c8_i32_36 = arith.constant 8 : i32
    %106 = arith.muli %c8_i32_35, %c8_i32_36 : i32
    %107 = tpu.assume_multiple %106, 8 : i32
    %108 = arith.index_cast %107 : i32 to index
    %c0_37 = arith.constant 0 : index
    %109 = vector.load %arg8[%108, %c0_37] : memref<80x128xf32, #tpu.memory_space<vmem>>, vector<8x128xf32>
    %cst_38 = arith.constant dense<0.000000e+00> : vector<8x128xf32>
    %110 = tpu.matmul %105, %8, %cst_38 {dimension_numbers = #tpu.dot_dimension_numbers<[1], [0], [0], [1], [0, 0, 1, 1], [], []>} : vector<8x128xf32>, vector<128x128xf32>, vector<8x128xf32> -> vector<8x128xf32>
    %111 = arith.addf %109, %110 : vector<8x128xf32>
    %112 = math.tanh %111 : vector<8x128xf32>
    %113 = vector.broadcast %c8_i32_35 : i32 to vector<8x1xi32>
    %114 = arith.cmpi slt, %113, %7 : vector<8x1xi32>
    %115 = vector.shape_cast %114 : vector<8x1xi1> to vector<8x1xi1>
    %116 = vector.broadcast %115 : vector<8x1xi1> to vector<8x128xi1>
    %117 = arith.select %116, %112, %105 : vector<8x128xi1>, vector<8x128xf32>
    %c9_i32 = arith.constant 9 : i32
    %c8_i32_39 = arith.constant 8 : i32
    %118 = arith.muli %c9_i32, %c8_i32_39 : i32
    %119 = tpu.assume_multiple %118, 8 : i32
    %120 = arith.index_cast %119 : i32 to index
    %c0_40 = arith.constant 0 : index
    %121 = vector.load %arg8[%120, %c0_40] : memref<80x128xf32, #tpu.memory_space<vmem>>, vector<8x128xf32>
    %cst_41 = arith.constant dense<0.000000e+00> : vector<8x128xf32>
    %122 = tpu.matmul %117, %8, %cst_41 {dimension_numbers = #tpu.dot_dimension_numbers<[1], [0], [0], [1], [0, 0, 1, 1], [], []>} : vector<8x128xf32>, vector<128x128xf32>, vector<8x128xf32> -> vector<8x128xf32>
    %123 = arith.addf %121, %122 : vector<8x128xf32>
    %124 = math.tanh %123 : vector<8x128xf32>
    %125 = vector.broadcast %c9_i32 : i32 to vector<8x1xi32>
    %126 = arith.cmpi slt, %125, %7 : vector<8x1xi32>
    %127 = vector.shape_cast %126 : vector<8x1xi1> to vector<8x1xi1>
    %128 = vector.broadcast %127 : vector<8x1xi1> to vector<8x128xi1>
    %129 = arith.select %128, %124, %117 : vector<8x128xi1>, vector<8x128xf32>
    %c10_i32 = arith.constant 10 : i32
    %c0_42 = arith.constant 0 : index
    %c0_43 = arith.constant 0 : index
    %130 = vector.load %arg5[%c0_42, %c0_43] : memref<128x128xf32, #tpu.memory_space<vmem>>, vector<128x128xf32>
    %cst_44 = arith.constant dense<0.000000e+00> : vector<8x128xf32>
    %131 = tpu.matmul %129, %130, %cst_44 {dimension_numbers = #tpu.dot_dimension_numbers<[1], [0], [0], [1], [0, 0, 1, 1], [], []>} : vector<8x128xf32>, vector<128x128xf32>, vector<8x128xf32> -> vector<8x128xf32>
    %c0_45 = arith.constant 0 : index
    %c0_46 = arith.constant 0 : index
    %132 = vector.load %arg6[%c0_45, %c0_46] : memref<1x128xf32, #tpu.memory_space<vmem>>, vector<1x128xf32>
    %133 = vector.broadcast %132 : vector<1x128xf32> to vector<8x128xf32>
    %134 = arith.addf %131, %133 : vector<8x128xf32>
    %c0_47 = arith.constant 0 : index
    %c0_48 = arith.constant 0 : index
    %135 = vector.load %arg7[%c0_47, %c0_48] : memref<8x128xf32, #tpu.memory_space<vmem>>, vector<8x128xf32>
    tpu.vector_store %arg7[%c0_47, %c0_48], %134 {strides = array<i32>} : memref<8x128xf32, #tpu.memory_space<vmem>>, vector<8x128xf32>,
    return
  }
}

</mosaic_0001>

<bundles_post_ra>
// kernel: rnn_forward.1
= control target key start
LH: loop header
LB: loop body
LE: loop exit
PB: predicated region body
PF: predicated region fallthrough
CT: control target
= control target key end

     0   :  { %v512_v3 = vmov 0   ;;  %v513_v38 = vmov 0.0   ;;  %s969_s2 = inlined_call_operand.vmem [shape: f32[128,128], index: 2, kind: input, shape index: {}]   ;;  %s970_s3 = inlined_call_operand.vmem [shape: f32[128,128], index: 3, kind: input, shape index: {}]   ;;  %s971_s1 = inlined_call_operand.vmem [shape: s32[8,1], index: 1, kind: input, shape index: {}]   ;;  %s972_s4 = inlined_call_operand.vmem [shape: f32[1,128], index: 4, kind: input, shape index: {}]   ;;  %s973_s0 = inlined_call_operand.vmem [shape: f32[80,128], index: 0, kind: input, shape index: {}]   ;;  %s974_s5 = inlined_call_operand.vmem [shape: f32[128,128], index: 5, kind: input, shape index: {}]   ;;  %s975_s6 = inlined_call_operand.vmem [shape: f32[1,128], index: 6, kind: input, shape index: {}]   ;;  %s976_s7 = inlined_call_operand.vmem [shape: f32[8,128], index: 7, kind: output, shape index: {}]  }
   0x1   :  { %v51_v0 = vld [vmem:[%s969_s2 + $0x78] sm:$0xff]  ;;  %v50_v1 = vld [vmem:[%s969_s2 + $0x70] sm:$0xff]  ;;  %487 = vset.pattern.permute.xlu0 %v512_v3  ;;  %488 = vset.pattern.permute.xlu1 %v512_v3  ;;  %v49_v5 = vld [vmem:[%s969_s2 + $0x68] sm:$0xff] }
   0x2   :  { %v563_v2 = vld [vmem:[%s970_s3 + $0x78] sm:$0xff]  ;;  %56 = vmatpush.msra.mxu0 %v51_v0  ;;  %v571_v4 = vld [vmem:[%s970_s3 + $0x70] sm:$0xff]  ;;  %v579_v6 = vld [vmem:[%s970_s3 + $0x68] sm:$0xff]  ;;  %489 = vset.pattern.permute.xlu2 %v512_v3 }
   0x3   :  { %131 = vmatpush.msra.mxu1 %v563_v2  ;;  %162 = vmatpush.msra.mxu2 %v563_v2  ;;  %v48_v7 = vld [vmem:[%s969_s2 + $0x60] sm:$0xff]  ;;  %v47_v9 = vld [vmem:[%s969_s2 + $0x58] sm:$0xff]  ;;  %v46_v11 = vld [vmem:[%s969_s2 + $0x50] sm:$0xff] }
   0x4   :  { %193 = vmatpush.msra.mxu3 %v563_v2  ;;  %57 = vmatpush.msra.mxu0 %v50_v1  ;;  %v590_v8 = vld [vmem:[%s970_s3 + $0x60] sm:$0xff]  ;;  %v601_v10 = vld [vmem:[%s970_s3 + $0x58] sm:$0xff]  ;;  %v612_v12 = vld [vmem:[%s970_s3 + $0x50] sm:$0xff] }
   0x5   :  { %132 = vmatpush.msra.mxu1 %v571_v4  ;;  %163 = vmatpush.msra.mxu2 %v571_v4  ;;  %v620_v13 = vld [vmem:[%s971_s1] sm:$0xff]  ;;  %v45_v14 = vld [vmem:[%s969_s2 + $0x48] sm:$0xff]  ;;  %v43_v19 = vld [vmem:[%s969_s2 + $0x38] sm:$0xff] }
   0x6   :  { %194 = vmatpush.msra.mxu3 %v571_v4  ;;  %58 = vmatpush.msra.mxu0 %v49_v5  ;;  %v628_v15 = vld [vmem:[%s970_s3 + $0x48] sm:$0xff]  ;;  %vm153_vm0 = vcmp.gt.s32.totalorder %v620_v13, 0  ;;  %v44_v17 = vld [vmem:[%s969_s2 + $0x40] sm:$0xff]  ;;  %v651_v20 = vld [vmem:[%s970_s3 + $0x38] sm:$0xff]  ;;  %vm184_vm1 = vcmp.gt.s32.totalorder %v620_v13, 1  ;;  %vm339_vm2 = vcmp.gt.s32.totalorder %v620_v13, 6 }
   0x7   :  { %133 = vmatpush.msra.mxu1 %v579_v6  ;;  %164 = vmatpush.msra.mxu2 %v579_v6  ;;  %v154_v16 = vsel %vm153_vm0, 1, %v512_v3  ;;  %v641_v18 = vld [vmem:[%s970_s3 + $0x40] sm:$0xff]  ;;  %v42_v21 = vld [vmem:[%s969_s2 + $0x30] sm:$0xff]  ;;  %v185_v23 = vsel %vm184_vm1, 1, %v512_v3  ;;  %v41_v24 = vld [vmem:[%s969_s2 + $0x28] sm:$0xff]  ;;  %v340_v32 = vsel %vm339_vm2, 1, %v512_v3 }
   0x8   :  { %195 = vmatpush.msra.mxu3 %v579_v6  ;;  %59 = vmatpush.msra.mxu0 %v48_v7  ;;  %v663_v22 = vld [vmem:[%s970_s3 + $0x30] sm:$0xff]  ;;  %v675_v25 = vld [vmem:[%s970_s3 + $0x28] sm:$0xff]  ;;  %v40_v26 = vld [vmem:[%s969_s2 + $0x20] sm:$0xff]  ;;  %vm432_vm3 = vcmp.gt.s32.totalorder %v620_v13, 9  ;;  %vm215_vm5 = vcmp.gt.s32.totalorder %v620_v13, 2  ;;  %vm246_vm6 = vcmp.gt.s32.totalorder %v620_v13, 3 }
   0x9   :  { %134 = vmatpush.msra.mxu1 %v590_v8  ;;  %165 = vmatpush.msra.mxu2 %v590_v8  ;;  %v686_v27 = vld [vmem:[%s970_s3 + $0x20] sm:$0xff]  ;;  %v39_v28 = vld [vmem:[%s969_s2 + $0x18] sm:$0xff]  ;;  %v38_v30 = vld [vmem:[%s969_s2 + $0x10] sm:$0xff]  ;;  %v433_v39 = vsel %vm432_vm3, 1, %v512_v3  ;;  %v216_v50 = vsel %vm215_vm5, 1, %v512_v3  ;;  %v247_v51 = vsel %vm246_vm6, 1, %v512_v3 }
   0xa   :  { %196 = vmatpush.msra.mxu3 %v590_v8  ;;  %60 = vmatpush.msra.mxu0 %v47_v9  ;;  %v696_v29 = vld [vmem:[%s970_s3 + $0x18] sm:$0xff]  ;;  %v708_v31 = vld [vmem:[%s970_s3 + $0x10] sm:$0xff]  ;;  %v37_v33 = vld [vmem:[%s969_s2 + $0x8] sm:$0xff]  ;;  %vm370_vm7 = vcmp.gt.s32.totalorder %v620_v13, 7  ;;  %vm277_vm10 = vcmp.gt.s32.totalorder %v620_v13, 4  ;;  %vm308_vm11 = vcmp.gt.s32.totalorder %v620_v13, 5 }
   0xb   :  { %135 = vmatpush.msra.mxu1 %v601_v10  ;;  %166 = vmatpush.msra.mxu2 %v601_v10  ;;  %v720_v34 = vld [vmem:[%s970_s3 + $0x8] sm:$0xff]  ;;  %v36_v35 = vld [vmem:[%s969_s2] sm:$0xff]  ;;  %v28_v49 = vld [vmem:[%s973_s0 + $0x10] sm:$0xff]  ;;  %v371_v53 = vsel %vm370_vm7, 1, %v512_v3  ;;  %v309_v7 = vsel %vm308_vm11, 1, %v512_v3  ;;  %vm401_vm12 = vcmp.gt.s32.totalorder %v620_v13, 8 }
   0xc   :  { %197 = vmatpush.msra.mxu3 %v601_v10  ;;  %61 = vmatpush.msra.mxu0 %v46_v11  ;;  %v731_v36 = vld [vmem:[%s970_s3] sm:$0xff]  ;;  %v27_v40 = vld [vmem:[%s973_s0 + $0x8] sm:$0xff]  ;;  %v29_v60 = vld [vmem:[%s973_s0 + $0x18] sm:$0xff]  ;;  %v402_v9 = vsel %vm401_vm12, 1, %v512_v3 }
   0xd   :  { %136 = vmatpush.msra.mxu1 %v612_v12  ;;  %156 = vperm.xlu0 %487, %v154_v16   ;;  %v26_v37 = vld [vmem:[%s973_s0] sm:$0xff] }
   0xe   :  { %167 = vmatpush.msra.mxu2 %v612_v12  ;;  %62 = vmatpush.msra.mxu0 %v45_v14  ;;  %v835_v41 = vld [vmem:[%s972_s4] ss:$0 sm:$0xff] }
   0xf   :  { %137 = vmatpush.msra.mxu1 %v628_v15  ;;  %198 = vmatpush.msra.mxu3 %v612_v12  ;;  %v30_v5 = vld [vmem:[%s973_s0 + $0x20] sm:$0xff] }
  0x10   :  { %168 = vmatpush.msra.mxu2 %v628_v15  ;;  %63 = vmatpush.msra.mxu0 %v44_v17  ;;  %v31_v17 = vld [vmem:[%s973_s0 + $0x28] sm:$0xff] }
  0x11   :  { %138 = vmatpush.msra.mxu1 %v641_v18  ;;  %199 = vmatpush.msra.mxu3 %v628_v15 }
  0x12   :  { %169 = vmatpush.msra.mxu2 %v641_v18  ;;  %64 = vmatpush.msra.mxu0 %v43_v19 }
  0x13   :  { %139 = vmatpush.msra.mxu1 %v651_v20  ;;  %200 = vmatpush.msra.mxu3 %v641_v18 }
  0x14   :  { %170 = vmatpush.msra.mxu2 %v651_v20  ;;  %65 = vmatpush.msra.mxu0 %v42_v21 }
  0x15   :  { %140 = vmatpush.msra.mxu1 %v663_v22  ;;  %187 = vperm.xlu0 %487, %v185_v23   ;;  %v32_v23 = vld [vmem:[%s973_s0 + $0x30] sm:$0xff] }
  0x16   :  { %171 = vmatpush.msra.mxu2 %v663_v22  ;;  %66 = vmatpush.msra.mxu0 %v41_v24 }
  0x17   :  { %141 = vmatpush.msra.mxu1 %v675_v25  ;;  %201 = vmatpush.msra.mxu3 %v651_v20 }
  0x18   :  { %172 = vmatpush.msra.mxu2 %v675_v25  ;;  %67 = vmatpush.msra.mxu0 %v40_v26 }
  0x19   :  { %142 = vmatpush.msra.mxu1 %v686_v27  ;;  %202 = vmatpush.msra.mxu3 %v663_v22 }
  0x1a   :  { %173 = vmatpush.msra.mxu2 %v686_v27  ;;  %68 = vmatpush.msra.mxu0 %v39_v28 }
  0x1b   :  { %143 = vmatpush.msra.mxu1 %v696_v29  ;;  %203 = vmatpush.msra.mxu3 %v675_v25 }
  0x1c   :  { %174 = vmatpush.msra.mxu2 %v696_v29  ;;  %69 = vmatpush.msra.mxu0 %v38_v30 }
  0x1d   :  { %144 = vmatpush.msra.mxu1 %v708_v31  ;;  %342 = vperm.xlu0 %487, %v340_v32  }
  0x1e   :  { %175 = vmatpush.msra.mxu2 %v708_v31  ;;  %70 = vmatpush.msra.mxu0 %v37_v33 }
  0x1f   :  { %145 = vmatpush.msra.mxu1 %v720_v34  ;;  %204 = vmatpush.msra.mxu3 %v686_v27 }
  0x20   :  { %176 = vmatpush.msra.mxu2 %v720_v34  ;;  %71 = vmatpush.msra.mxu0 %v36_v35 }
  0x21   :  { %146 = vmatpush.msra.mxu1 %v731_v36  ;;  %72 = vmatmul.f32.vlgmr.msra.gmra.mxu0 %v26_v37 }
  0x22   :  { %147 = vmatmul.f32.vlgmr.msra.gmra.mxu1 %v513_v38  ;;  %177 = vmatpush.msra.mxu2 %v731_v36 }
  0x23   :  { %205 = vmatpush.msra.mxu3 %v696_v29  ;;  %224 = vmatpush.msrb.mxu1 %v563_v2 }
  0x24   :  { %255 = vmatpush.msrb.mxu2 %v563_v2  ;;  %410 = vmatpush.msrb.mxu0 %v563_v2 }
  0x25   :  { %206 = vmatpush.msra.mxu3 %v708_v31  ;;  %435 = vperm.xlu0 %487, %v433_v39   ;;  %v34_v39 = vld [vmem:[%s973_s0 + $0x40] sm:$0xff] }
  0x26   :  { %225 = vmatpush.msrb.mxu1 %v571_v4  ;;  %256 = vmatpush.msrb.mxu2 %v571_v4 }
  0x27   :  { %207 = vmatpush.msra.mxu3 %v720_v34  ;;  %411 = vmatpush.msrb.mxu0 %v571_v4 }
  0x28   :  { %226 = vmatpush.msrb.mxu1 %v579_v6  ;;  %257 = vmatpush.msrb.mxu2 %v579_v6 }
  0x29   :  { %208 = vmatpush.msra.mxu3 %v731_v36  ;;  %412 = vmatpush.msrb.mxu0 %v579_v6 }
  0x2a   :  { %227 = vmatpush.msrb.mxu1 %v590_v8  ;;  %258 = vmatpush.msrb.mxu2 %v590_v8 }
  0x2b   :  { %286 = vmatpush.msrb.mxu3 %v563_v2  ;;  %413 = vmatpush.msrb.mxu0 %v590_v8 }
  0x2c   :  { %228 = vmatpush.msrb.mxu1 %v601_v10  ;;  %259 = vmatpush.msrb.mxu2 %v601_v10 }
  0x2d   :  { %287 = vmatpush.msrb.mxu3 %v571_v4  ;;  %414 = vmatpush.msrb.mxu0 %v601_v10 }
  0x2e   :  { %229 = vmatpush.msrb.mxu1 %v612_v12  ;;  %260 = vmatpush.msrb.mxu2 %v612_v12 }
  0x2f   :  { %288 = vmatpush.msrb.mxu3 %v579_v6  ;;  %415 = vmatpush.msrb.mxu0 %v612_v12 }
  0x30   :  { %230 = vmatpush.msrb.mxu1 %v628_v15  ;;  %261 = vmatpush.msrb.mxu2 %v628_v15 }
  0x31   :  { %289 = vmatpush.msrb.mxu3 %v590_v8  ;;  %416 = vmatpush.msrb.mxu0 %v628_v15 }
  0x32   :  { %231 = vmatpush.msrb.mxu1 %v641_v18  ;;  %262 = vmatpush.msrb.mxu2 %v641_v18 }
  0x33   :  { %290 = vmatpush.msrb.mxu3 %v601_v10  ;;  %417 = vmatpush.msrb.mxu0 %v641_v18 }
  0x34   :  { %232 = vmatpush.msrb.mxu1 %v651_v20  ;;  %263 = vmatpush.msrb.mxu2 %v651_v20 }
  0x35   :  { %291 = vmatpush.msrb.mxu3 %v612_v12  ;;  %418 = vmatpush.msrb.mxu0 %v651_v20 }
  0x36   :  { %233 = vmatpush.msrb.mxu1 %v663_v22  ;;  %264 = vmatpush.msrb.mxu2 %v663_v22 }
  0x37   :  { %292 = vmatpush.msrb.mxu3 %v628_v15  ;;  %419 = vmatpush.msrb.mxu0 %v663_v22 }
  0x38   :  { %234 = vmatpush.msrb.mxu1 %v675_v25  ;;  %265 = vmatpush.msrb.mxu2 %v675_v25 }
  0x39   :  { %293 = vmatpush.msrb.mxu3 %v641_v18  ;;  %420 = vmatpush.msrb.mxu0 %v675_v25 }
  0x3a   :  { %235 = vmatpush.msrb.mxu1 %v686_v27  ;;  %266 = vmatpush.msrb.mxu2 %v686_v27 }
  0x3b   :  { %294 = vmatpush.msrb.mxu3 %v651_v20  ;;  %421 = vmatpush.msrb.mxu0 %v686_v27 }
  0x3c   :  { %236 = vmatpush.msrb.mxu1 %v696_v29  ;;  %267 = vmatpush.msrb.mxu2 %v696_v29 }
  0x3d   :  { %295 = vmatpush.msrb.mxu3 %v663_v22  ;;  %422 = vmatpush.msrb.mxu0 %v696_v29 }
  0x3e   :  { %237 = vmatpush.msrb.mxu1 %v708_v31  ;;  %268 = vmatpush.msrb.mxu2 %v708_v31 }
  0x3f   :  { %296 = vmatpush.msrb.mxu3 %v675_v25  ;;  %423 = vmatpush.msrb.mxu0 %v708_v31 }
  0x40   :  { %238 = vmatpush.msrb.mxu1 %v720_v34  ;;  %269 = vmatpush.msrb.mxu2 %v720_v34 }
  0x41   :  { %297 = vmatpush.msrb.mxu3 %v686_v27  ;;  %424 = vmatpush.msrb.mxu0 %v720_v34 }
  0x42   :  { %239 = vmatpush.msrb.mxu1 %v731_v36  ;;  %270 = vmatpush.msrb.mxu2 %v731_v36 }
  0x43   :  { %298 = vmatpush.msrb.mxu3 %v696_v29  ;;  %425 = vmatpush.msrb.mxu0 %v731_v36 }
  0x44   :  { %317 = vmatpush.msra.mxu1 %v563_v2  ;;  %75 = vmatmul.f32.gmra.mxu0 %v27_v40 }
  0x45   :  { %299 = vmatpush.msrb.mxu3 %v708_v31  ;;  %218 = vperm.xlu1 %488, %v216_v50   ;;  %v453_v50 = vld [vmem:[%s974_s5 + $0x70] sm:$0xff] }
  0x46   :  { %318 = vmatpush.msra.mxu1 %v571_v4 }
  0x47   :  { %300 = vmatpush.msrb.mxu3 %v720_v34 }
  0x48   :  { %319 = vmatpush.msra.mxu1 %v579_v6 }
  0x49   :  { %301 = vmatpush.msrb.mxu3 %v731_v36 }
  0x4a   :  { %320 = vmatpush.msra.mxu1 %v590_v8 }
  0x4c   :  { %321 = vmatpush.msra.mxu1 %v601_v10  ;;  %78 = vmatmul.f32.gmra.mxu0 %v28_v49  ;;  %v454_v49 = vld [vmem:[%s974_s5 + $0x78] sm:$0xff] }
  0x4d   :  { %249 = vperm.xlu1 %488, %v247_v51   ;;  %v452_v51 = vld [vmem:[%s974_s5 + $0x68] sm:$0xff] }
  0x4e   :  { %322 = vmatpush.msra.mxu1 %v612_v12 }
  0x50   :  { %323 = vmatpush.msra.mxu1 %v628_v15 }
  0x52   :  { %324 = vmatpush.msra.mxu1 %v641_v18 }
  0x54   :  { %325 = vmatpush.msra.mxu1 %v651_v20  ;;  %81 = vmatmul.f32.gmra.mxu0 %v29_v60 }
  0x55   :  { %373 = vperm.xlu1 %488, %v371_v53   ;;  %v450_v53 = vld [vmem:[%s974_s5 + $0x58] sm:$0xff] }
  0x56   :  { %326 = vmatpush.msra.mxu1 %v663_v22 }
  0x58   :  { %327 = vmatpush.msra.mxu1 %v675_v25 }
  0x5a   :  { %328 = vmatpush.msra.mxu1 %v686_v27 }
  0x5c   :  { %329 = vmatpush.msra.mxu1 %v696_v29  ;;  %84 = vmatmul.f32.gmra.mxu0 %v30_v5  ;;  %v442_v5 = vld [vmem:[%s974_s5 + $0x18] sm:$0xff] }
  0x5e   :  { %330 = vmatpush.msra.mxu1 %v708_v31 }
  0x60   :  { %331 = vmatpush.msra.mxu1 %v720_v34 }
  0x62   :  { %332 = vmatpush.msra.mxu1 %v731_v36 }
  0x64   :  { %87 = vmatmul.f32.gmra.mxu0 %v31_v17  ;;  %v491_v17 = vld [vmem:[%s975_s6] ss:$0 sm:$0xff] }
  0x6c   :  { %90 = vmatmul.f32.gmra.mxu0 %v32_v23 }
  0x7f   :  { %v157_v46 = vpop.permute.xlu0 %156 }
  0x80   :  { %vm158_vm4 = vcmp.eq.s32.totalorder %v157_v46, 1 }
  0x87   :  { %v188_v57 = vpop.permute.xlu0 %187 }
  0x88   :  { %vm189_vm8 = vcmp.eq.s32.totalorder %v188_v57, 1 }
  0x9e   :  { %v73_v42 = vpop.f32.mrf.mxu0 }
  0x9f   :  { %v148_v43 = vpop.f32.mrf.mxu1  ;;  %v74_v44 = vadd.f32 %v835_v41, %v73_v42 }
  0xa1   :  { %v151_v45 = vadd.f32 %v148_v43, %v74_v44 }
  0xa3   :  { %492 = vtanh.f32 %v151_v45 }
  0xa9   :  { %v493_v47 = vpop.eup %492 }
  0xaa   :  { %484 = vmatmul.msk.f32.vlgmr.msra.gmra.mxu2 %vm158_vm4, %v493_v47  ;;  %v159_v48 = vsel %vm158_vm4, %v493_v47, 0.0 }
  0xab   :  { %348 = vmatpush.msra.mxu2 %v563_v2 }
  0xad   :  { %349 = vmatpush.msra.mxu2 %v571_v4 }
  0xaf   :  { %350 = vmatpush.msra.mxu2 %v579_v6 }
  0xb1   :  { %351 = vmatpush.msra.mxu2 %v590_v8 }
  0xb3   :  { %352 = vmatpush.msra.mxu2 %v601_v10 }
  0xb5   :  { %353 = vmatpush.msra.mxu2 %v612_v12 }
  0xb7   :  { %354 = vmatpush.msra.mxu2 %v628_v15  ;;  %v219_v1 = vpop.permute.xlu1 %218 }
  0xb8   :  { %vm220_vm9 = vcmp.eq.s32.totalorder %v219_v1, 1  ;;  %v445_v1 = vld [vmem:[%s974_s5 + $0x30] sm:$0xff] }
  0xb9   :  { %355 = vmatpush.msra.mxu2 %v641_v18 }
  0xbb   :  { %356 = vmatpush.msra.mxu2 %v651_v20 }
  0xbd   :  { %357 = vmatpush.msra.mxu2 %v663_v22 }
  0xbf   :  { %358 = vmatpush.msra.mxu2 %v675_v25  ;;  %v250_v14 = vpop.permute.xlu1 %249 }
  0xc0   :  { %vm251_vm13 = vcmp.eq.s32.totalorder %v250_v14, 1 }
  0xc1   :  { %359 = vmatpush.msra.mxu2 %v686_v27  ;;  %v76_v52 = vpop.f32.mrf.mxu0 }
  0xc2   :  { %v77_v54 = vadd.f32 %v835_v41, %v76_v52  ;;  %v451_v52 = vld [vmem:[%s974_s5 + $0x60] sm:$0xff] }
  0xc3   :  { %360 = vmatpush.msra.mxu2 %v696_v29 }
  0xc5   :  { %361 = vmatpush.msra.mxu2 %v708_v31 }
  0xc7   :  { %362 = vmatpush.msra.mxu2 %v720_v34  ;;  %v374_v45 = vpop.permute.xlu1 %373 }
  0xc8   :  { %vm375_vm1 = vcmp.eq.s32.totalorder %v374_v45, 1 }
  0xc9   :  { %363 = vmatpush.msra.mxu2 %v731_v36  ;;  %v79_v61 = vpop.f32.mrf.mxu0 }
  0xca   :  { %v80_v62 = vadd.f32 %v835_v41, %v79_v61 }
 0x12d   :  { %v179_v55 = vpop.f32.mrf.mxu2 }
 0x12e   :  { %v182_v56 = vadd.f32 %v179_v55, %v77_v54  ;;  %v449_v54 = vld [vmem:[%s974_s5 + $0x50] sm:$0xff] }
 0x130   :  { %494 = vtanh.f32 %v182_v56 }
 0x136   :  { %v495_v58 = vpop.eup %494 }
 0x137   :  { %v190_v59 = vsel %vm189_vm8, %v495_v58, %v159_v48  ;;  %v35_v48 = vld [vmem:[%s973_s0 + $0x48] sm:$0xff] }
 0x138   :  { %209 = vmatmul.f32.vlgmr.msra.gmra.mxu3 %v190_v59 }
 0x139   :  { %379 = vmatpush.msra.mxu3 %v563_v2 }
 0x13b   :  { %380 = vmatpush.msra.mxu3 %v571_v4 }
 0x13d   :  { %381 = vmatpush.msra.mxu3 %v579_v6  ;;  %v278_v6 = vsel %vm277_vm10, 1, %v512_v3 }
 0x13e   :  { %280 = vperm.xlu2 %489, %v278_v6   ;;  %v441_v6 = vld [vmem:[%s974_s5 + $0x10] sm:$0xff] }
 0x13f   :  { %382 = vmatpush.msra.mxu3 %v590_v8  ;;  %v82_v8 = vpop.f32.mrf.mxu0 }
 0x141   :  { %383 = vmatpush.msra.mxu3 %v601_v10  ;;  %v83_v10 = vadd.f32 %v835_v41, %v82_v8  ;;  %v439_v8 = vld [vmem:[%s974_s5] sm:$0xff] }
 0x143   :  { %384 = vmatpush.msra.mxu3 %v612_v12 }
 0x145   :  { %385 = vmatpush.msra.mxu3 %v628_v15 }
 0x146   :  { %311 = vperm.xlu2 %489, %v309_v7   ;;  %v440_v7 = vld [vmem:[%s974_s5 + $0x8] sm:$0xff] }
 0x147   :  { %386 = vmatpush.msra.mxu3 %v641_v18  ;;  %v85_v13 = vpop.f32.mrf.mxu0 }
 0x148   :  { %v86_v18 = vadd.f32 %v835_v41, %v85_v13 }
 0x149   :  { %387 = vmatpush.msra.mxu3 %v651_v20 }
 0x14b   :  { %388 = vmatpush.msra.mxu3 %v663_v22 }
 0x14d   :  { %389 = vmatpush.msra.mxu3 %v675_v25 }
 0x14e   :  { %404 = vperm.xlu2 %489, %v402_v9  }
 0x14f   :  { %390 = vmatpush.msra.mxu3 %v686_v27  ;;  %v88_v24 = vpop.f32.mrf.mxu0 }
 0x150   :  { %v89_v25 = vadd.f32 %v835_v41, %v88_v24 }
 0x151   :  { %391 = vmatpush.msra.mxu3 %v696_v29 }
 0x153   :  { %392 = vmatpush.msra.mxu3 %v708_v31  ;;  %v33_v31 = vld [vmem:[%s973_s0 + $0x38] sm:$0xff] }
 0x154   :  { %93 = vmatmul.f32.gmra.mxu0 %v33_v31 }
 0x155   :  { %393 = vmatpush.msra.mxu3 %v720_v34 }
 0x157   :  { %394 = vmatpush.msra.mxu3 %v731_v36  ;;  %v91_v32 = vpop.f32.mrf.mxu0  ;;  %v343_v36 = vpop.permute.xlu0 %342 }
 0x158   :  { %v92_v33 = vadd.f32 %v835_v41, %v91_v32  ;;  %vm344_vm0 = vcmp.eq.s32.totalorder %v343_v36, 1 }
 0x15c   :  { %96 = vmatmul.f32.gmra.mxu0 %v34_v39 }
 0x15f   :  { %v436_v14 = vpop.permute.xlu0 %435 }
 0x160   :  { %vm437_vm3 = vcmp.eq.s32.totalorder %v436_v14, 1 }
 0x164   :  { %99 = vmatmul.f32.gmra.mxu0 %v35_v48 }
 0x198   :  { %v281_v20 = vpop.permute.xlu2 %280 }
 0x199   :  { %vm282_vm14 = vcmp.eq.s32.totalorder %v281_v20, 1 }
 0x1a0   :  { %v312_v28 = vpop.permute.xlu2 %311 }
 0x1a1   :  { %vm313_vm15 = vcmp.eq.s32.totalorder %v312_v28, 1 }
 0x1bb   :  { %v210_v63 = vpop.f32.mrf.mxu3 }
 0x1bc   :  { %v213_v0 = vadd.f32 %v210_v63, %v80_v62  ;;  %v448_v62 = vld [vmem:[%s974_s5 + $0x48] sm:$0xff]  ;;  %v447_v63 = vld [vmem:[%s974_s5 + $0x40] sm:$0xff] }
 0x1be   :  { %496 = vtanh.f32 %v213_v0  ;;  %v446_v0 = vld [vmem:[%s974_s5 + $0x38] sm:$0xff] }
 0x1c4   :  { %v497_v2 = vpop.eup %496 }
 0x1c5   :  { %v221_v4 = vsel %vm220_vm9, %v497_v2, %v190_v59  ;;  %v405_v59 = vpop.permute.xlu2 %404  ;;  %v444_v2 = vld [vmem:[%s974_s5 + $0x28] sm:$0xff] }
 0x1c6   :  { %240 = vmatmul.f32.vlgmr.msrb.gmra.mxu1 %v221_v4  ;;  %vm406_vm2 = vcmp.eq.s32.totalorder %v405_v59, 1 }
 0x1c7   :  { %459 = vmatpush.msrb.mxu1 %v454_v49 }
 0x1c9   :  { %460 = vmatpush.msrb.mxu1 %v453_v50 }
 0x1cb   :  { %461 = vmatpush.msrb.mxu1 %v452_v51 }
 0x1cd   :  { %462 = vmatpush.msrb.mxu1 %v451_v52 }
 0x1cf   :  { %463 = vmatpush.msrb.mxu1 %v450_v53 }
 0x1d1   :  { %v94_v40 = vpop.f32.mrf.mxu0  ;;  %464 = vmatpush.msrb.mxu1 %v449_v54 }
 0x1d2   :  { %v95_v42 = vadd.f32 %v835_v41, %v94_v40 }
 0x1d3   :  { %465 = vmatpush.msrb.mxu1 %v448_v62 }
 0x1d5   :  { %466 = vmatpush.msrb.mxu1 %v447_v63 }
 0x1d7   :  { %467 = vmatpush.msrb.mxu1 %v446_v0 }
 0x1d9   :  { %v97_v55 = vpop.f32.mrf.mxu0  ;;  %468 = vmatpush.msrb.mxu1 %v445_v1 }
 0x1da   :  { %v98_v56 = vadd.f32 %v835_v41, %v97_v55 }
 0x1db   :  { %469 = vmatpush.msrb.mxu1 %v444_v2 }
 0x1e1   :  { %v100_v9 = vpop.f32.mrf.mxu0 }
 0x243   :  { %v241_v11 = vpop.f32.mrf.mxu1 }
 0x244   :  { %v244_v12 = vadd.f32 %v241_v11, %v83_v10  ;;  %v101_v10 = vadd.f32 %v835_v41, %v100_v9 }
 0x246   :  { %498 = vtanh.f32 %v244_v12 }
 0x24c   :  { %v499_v15 = vpop.eup %498 }
 0x24d   :  { %v252_v16 = vsel %vm251_vm13, %v499_v15, %v221_v4  ;;  %v443_v4 = vld [vmem:[%s974_s5 + $0x20] sm:$0xff] }
 0x24e   :  { %271 = vmatmul.f32.vlgmr.msrb.gmra.mxu2 %v252_v16  ;;  %470 = vmatpush.msrb.mxu1 %v443_v4 }
 0x250   :  { %471 = vmatpush.msrb.mxu1 %v442_v5 }
 0x252   :  { %472 = vmatpush.msrb.mxu1 %v441_v6 }
 0x254   :  { %473 = vmatpush.msrb.mxu1 %v440_v7 }
 0x256   :  { %474 = vmatpush.msrb.mxu1 %v439_v8 }
 0x2d1   :  { %v272_v3 = vpop.f32.mrf.mxu2 }
 0x2d2   :  { %v275_v19 = vadd.f32 %v272_v3, %v86_v18 }
 0x2d4   :  { %500 = vtanh.f32 %v275_v19 }
 0x2da   :  { %v501_v21 = vpop.eup %500 }
 0x2db   :  { %v283_v22 = vsel %vm282_vm14, %v501_v21, %v252_v16 }
 0x2dc   :  { %302 = vmatmul.f32.vlgmr.msrb.gmra.mxu3 %v283_v22 }
 0x35f   :  { %v303_v26 = vpop.f32.mrf.mxu3 }
 0x360   :  { %v306_v27 = vadd.f32 %v303_v26, %v89_v25 }
 0x362   :  { %502 = vtanh.f32 %v306_v27 }
 0x368   :  { %v503_v29 = vpop.eup %502 }
 0x369   :  { %v314_v30 = vsel %vm313_vm15, %v503_v29, %v283_v22 }
 0x36a   :  { %333 = vmatmul.f32.vlgmr.msra.gmra.mxu1 %v314_v30 }
 0x3e7   :  { %v334_v34 = vpop.f32.mrf.mxu1 }
 0x3e8   :  { %v337_v35 = vadd.f32 %v334_v34, %v92_v33 }
 0x3ea   :  { %504 = vtanh.f32 %v337_v35 }
 0x3f0   :  { %v505_v37 = vpop.eup %504 }
 0x3f1   :  { %v345_v38 = vsel %vm344_vm0, %v505_v37, %v314_v30 }
 0x3f2   :  { %364 = vmatmul.f32.vlgmr.msra.gmra.mxu2 %v345_v38 }
 0x475   :  { %v365_v43 = vpop.f32.mrf.mxu2 }
 0x476   :  { %v368_v44 = vadd.f32 %v365_v43, %v95_v42 }
 0x478   :  { %506 = vtanh.f32 %v368_v44 }
 0x47e   :  { %v507_v46 = vpop.eup %506 }
 0x47f   :  { %v376_v47 = vsel %vm375_vm1, %v507_v46, %v345_v38 }
 0x480   :  { %395 = vmatmul.f32.vlgmr.msra.gmra.mxu3 %v376_v47 }
 0x503   :  { %v396_v57 = vpop.f32.mrf.mxu3 }
 0x504   :  { %v399_v58 = vadd.f32 %v396_v57, %v98_v56 }
 0x506   :  { %508 = vtanh.f32 %v399_v58 }
 0x50c   :  { %v509_v60 = vpop.eup %508 }
 0x50d   :  { %v407_v61 = vsel %vm406_vm2, %v509_v60, %v376_v47 }
 0x50e   :  { %426 = vmatmul.f32.vlgmr.msrb.gmra.mxu0 %v407_v61 }
 0x58b   :  { %v427_v11 = vpop.f32.mrf.mxu0 }
 0x58c   :  { %v430_v12 = vadd.f32 %v427_v11, %v101_v10 }
 0x58e   :  { %510 = vtanh.f32 %v430_v12 }
 0x594   :  { %v511_v15 = vpop.eup %510 }
 0x595   :  { %v438_v16 = vsel %vm437_vm3, %v511_v15, %v407_v61 }
 0x596   :  { %475 = vmatmul.f32.vlgmr.msrb.gmra.mxu1 %v438_v16 }
 0x613   :  { %v476_v13 = vpop.f32.mrf.mxu1 }
 0x614   :  { %v477_v18 = vadd.f32 %v491_v17, %v476_v13 }
 0x616   :  { %479 = vst [vmem:[%s976_s7] sm:$0xff] %v477_v18 }

</bundles_post_ra>
